<compile_context>
chip_gen: v7x
topology: tpu7x:2x2x1
jax: 0.10.0
libtpu: 0.0.40
codegen_flags: <defaults>
</compile_context>

<pallas_src>
import numpy as np
import jax
import jax.numpy as jnp
from jax.experimental import pallas as pl
from jax.experimental.pallas import tpu as pltpu


def _bifpn_add2_kernel(w_ref, x0_ref, x1_ref, wc_ref, b_ref, o_ref):
    """One (batch, spatial-tile) step.

    w_ref : SMEM (2,) f32      normalized fusion weights
    x0_ref: VMEM (C1, T)       input-0 slab (spatial flattened on lanes), IO dtype
    x1_ref: VMEM (C1, T)       input-1 slab, IO dtype
    wc_ref: VMEM (C2, C1)      1x1 conv weight (resident; constant index_map)
    b_ref : VMEM (C2, 1) f32   conv bias (broadcast over lanes)
    o_ref : VMEM (C2, T)       output slab, IO dtype
    """
    w0 = w_ref[0]
    w1 = w_ref[1]

    # Weighted add in f32 (VPU), regardless of the (possibly bf16) IO dtype.
    x0 = x0_ref[...].astype(jnp.float32)
    x1 = x1_ref[...].astype(jnp.float32)
    z = w0 * x0 + w1 * x1

    # SiLU: z * sigmoid(z).  lax.logistic runs on the EUP slot (no f32 divide on VALU).
    a = z * jax.nn.sigmoid(z)

    # 1x1 conv as MXU matmul: feed the MXU in the weight dtype (bf16 -> single-pass
    # MXU on every generation), accumulate in f32, add bias, cast to the out dtype.
    a = a.astype(wc_ref.dtype)
    out = jnp.dot(wc_ref[...], a, preferred_element_type=jnp.float32)
    o_ref[...] = (out + b_ref[...]).astype(o_ref.dtype)


def _round_up(x, m):
    return ((x + m - 1) // m) * m


def _pick_spatial_tile(hw, c1, c2, batch, in_bytes, out_bytes, budget_bytes=24 << 20):
    """Largest lane-aligned (multiple-of-128) spatial tile whose per-step VMEM
    working set fits `budget_bytes`; guarantees >= 2 spatial tiles when batch == 1
    so both v7x TensorCores stay busy.  Padding waste is minimized by choosing the
    tile from the required tile *count*."""
    hw128 = _round_up(hw, 128)
    # bytes per lane column: double-buffered in/out blocks + f32 elementwise temps + f32 acc
    per_lane = (2 * (2 * c1 * in_bytes + c2 * out_bytes)
                + 3 * c1 * 4 + c2 * 4)
    max_t = max(128, (budget_bytes // per_lane) // 128 * 128)
    n_tiles = max(1, -(-hw128 // max_t))          # ceil
    if batch == 1 and hw128 > 128:
        n_tiles = max(n_tiles, 2)                 # keep both v7x TCs busy at B == 1
    return _round_up(-(-hw128 // n_tiles), 128)   # ceil(hw128 / n) rounded to 128 lanes


def _estimate_vmem(c1, c2, t, in_bytes, out_bytes):
    io = 2 * (2 * c1 * t * in_bytes + c2 * t * out_bytes)     # double-buffered blocks
    temps = (3 * c1 + c2) * t * 4                             # z / sigmoid / a + f32 acc
    weights = 2 * (c2 * c1 * in_bytes + c2 * 4)               # resident wc / bias (2 bufs)
    return io + temps + weights


def bifpn_add2_forward(x0, x1, w, conv_w, conv_b, *, epsilon=1e-4, out_dtype=None):
    """BiFPN_Add2.forward.

    x0, x1 : (B, C1, H, W)  -- kept in their HBM dtype (bf16 recommended, f32 supported)
    w      : (2,)           fusion weights
    conv_w : (C2, C1, 1, 1) 1x1 conv weight
    conv_b : (C2,)          conv bias
    """
    B, C1, H, W = x0.shape
    C2 = conv_w.shape[0]
    HW = H * W

    in_dtype = x0.dtype
    out_dtype = in_dtype if out_dtype is None else jnp.dtype(out_dtype)
    in_bytes = jnp.dtype(in_dtype).itemsize
    out_bytes = jnp.dtype(out_dtype).itemsize

    # Normalized fusion weights (2 elements -> plain JAX scalar math, lands in SMEM).
    w = w.astype(jnp.float32)
    w_norm = w / (jnp.sum(w) + jnp.float32(epsilon))

    # Lane tiling + spatial padding (keeps every tile lane-dense for any H*W).
    T = _pick_spatial_tile(HW, C1, C2, B, in_bytes, out_bytes)
    HW_pad = _round_up(HW, T)

    x0r = x0.reshape(B, C1, HW)
    x1r = x1.reshape(B, C1, HW)
    if HW_pad != HW:
        pad = ((0, 0), (0, 0), (0, HW_pad - HW))
        x0r = jnp.pad(x0r, pad)
        x1r = jnp.pad(x1r, pad)

    # Conv weight in the IO dtype (bf16 path -> single-pass bf16 MXU); bias stays f32.
    wc = conv_w.reshape(C2, C1).astype(in_dtype)
    bc = conv_b.reshape(C2, 1).astype(jnp.float32)

    grid = (B, HW_pad // T)

    # VMEM limit: estimated working set (incl. f32 temporaries and the doubled
    # resident weight buffers) + headroom, capped at 32 MiB for v5e/v7x safety.
    vmem_est = _estimate_vmem(C1, C2, T, in_bytes, out_bytes)
    vmem_limit = int(min(32 << 20, max(8 << 20, vmem_est + (2 << 20))))

    cost = pl.CostEstimate(
        flops=int(2 * B * HW_pad * C1 * C2 + 4 * B * HW_pad * C1),
        transcendentals=int(B * HW_pad * C1),
        bytes_accessed=int(in_bytes * (2 * B * C1 * HW_pad + C2 * C1)
                           + out_bytes * B * C2 * HW_pad + 4 * (C2 + 2)),
    )

    out = pl.pallas_call(
        _bifpn_add2_kernel,
        out_shape=jax.ShapeDtypeStruct((B, C2, HW_pad), out_dtype),
        grid=grid,
        in_specs=[
            pl.BlockSpec(memory_space=pltpu.MemorySpace.SMEM),                 # w_norm (2,)
            pl.BlockSpec((pl.Squeezed(), C1, T), lambda b, t: (b, 0, t)),      # x0 slab
            pl.BlockSpec((pl.Squeezed(), C1, T), lambda b, t: (b, 0, t)),      # x1 slab
            # Constant index_map -> DMA'd once and kept resident across the grid.
            pl.BlockSpec((C2, C1), lambda b, t: (0, 0)),                       # conv weight
            pl.BlockSpec((C2, 1), lambda b, t: (0, 0)),                        # conv bias
        ],
        out_specs=pl.BlockSpec((pl.Squeezed(), C2, T), lambda b, t: (b, 0, t)),
        compiler_params=pltpu.CompilerParams(
            dimension_semantics=("parallel", "parallel"),
            vmem_limit_bytes=vmem_limit,
        ),
        cost_estimate=cost,
    )(w_norm, x0r, x1r, wc, bc)

    if HW_pad != HW:
        out = out[..., :HW]
    return out.reshape(B, C2, H, W)


def _ref_forward_np(x0, x1, w, conv_w, conv_b, epsilon=1e-4):
    """Plain numpy (float64) reference mirroring the PyTorch module."""
    x0 = np.asarray(x0, np.float64)
    x1 = np.asarray(x1, np.float64)
    w = np.asarray(w, np.float64)
    cw = np.asarray(conv_w, np.float64).reshape(conv_w.shape[0], -1)
    cb = np.asarray(conv_b, np.float64)
    wn = w / (w.sum() + epsilon)
    z = wn[0] * x0 + wn[1] * x1
    a = z / (1.0 + np.exp(-z))                       # SiLU
    out = np.einsum("oc,bchw->bohw", cw, a) + cb[None, :, None, None]
    return out.astype(np.float32)


if __name__ == "__main__":
    key = jax.random.PRNGKey(0)
    B, C1, C2, H, W = 2, 4, 4, 16, 16

    k0, k1, kw, kcw, kcb = jax.random.split(key, 5)
    x0 = jax.random.normal(k0, (B, C1, H, W), dtype=jnp.float32)
    x1 = jax.random.normal(k1, (B, C1, H, W), dtype=jnp.float32)
    # fusion weights (module init is ones; use deterministic positive randoms to exercise it)
    w = jax.random.uniform(kw, (2,), dtype=jnp.float32, minval=0.5, maxval=1.5)
    conv_w = jax.random.normal(kcw, (C2, C1, 1, 1), dtype=jnp.float32) * 0.1
    conv_b = jax.random.normal(kcb, (C2,), dtype=jnp.float32) * 0.1

    # --- f32 path, lane-aligned spatial (16x16 = 256 lanes) ---
    y = jax.block_until_ready(bifpn_add2_forward(x0, x1, w, conv_w, conv_b))
    assert y.shape == (B, C2, H, W), y.shape
    y_ref = _ref_forward_np(x0, x1, w, conv_w, conv_b)
    np.testing.assert_allclose(np.asarray(y, np.float32), y_ref, rtol=1e-4, atol=1e-5)

    # --- bf16 I/O path (recommended deployment dtype) ---
    x0b = x0.astype(jnp.bfloat16)
    x1b = x1.astype(jnp.bfloat16)
    yb = jax.block_until_ready(bifpn_add2_forward(x0b, x1b, w, conv_w, conv_b))
    assert yb.dtype == jnp.bfloat16 and yb.shape == (B, C2, H, W)
    yb_ref = _ref_forward_np(np.asarray(x0b, np.float32), np.asarray(x1b, np.float32),
                             w, np.asarray(conv_w.astype(jnp.bfloat16), np.float32), conv_b)
    np.testing.assert_allclose(np.asarray(yb, np.float32), yb_ref, rtol=2e-2, atol=2e-2)

    # --- non-128-multiple spatial + B=1 (exercises padding and the >=2-tile split) ---
    Hp = Wp = 20  # HW = 400 -> padded to a multiple of the 128-lane tile
    k2, k3 = jax.random.split(jax.random.PRNGKey(1))
    x0p = jax.random.normal(k2, (1, C1, Hp, Wp), dtype=jnp.float32)
    x1p = jax.random.normal(k3, (1, C1, Hp, Wp), dtype=jnp.float32)
    yp = jax.block_until_ready(bifpn_add2_forward(x0p, x1p, w, conv_w, conv_b))
    assert yp.shape == (1, C2, Hp, Wp), yp.shape
    yp_ref = _ref_forward_np(x0p, x1p, w, conv_w, conv_b)
    np.testing.assert_allclose(np.asarray(yp, np.float32), yp_ref, rtol=1e-4, atol=1e-5)

    print("KERNEL_OK")
</pallas_src>

<mosaic_0001>
module attributes {stable_mosaic.version = 11 : i64} {
  func.func @_bifpn_add2_kernel(%arg0: i32, %arg1: i32, %arg2: memref<2xf32, #tpu.memory_space<smem>>, %arg3: memref<1x4x256xf32, #tpu.memory_space<vmem>>, %arg4: memref<1x4x256xf32, #tpu.memory_space<vmem>>, %arg5: memref<4x4xf32, #tpu.memory_space<vmem>>, %arg6: memref<4x1xf32, #tpu.memory_space<vmem>>, %arg7: memref<1x4x256xf32, #tpu.memory_space<vmem>>) attributes {dimension_semantics = [#tpu.dimension_semantics<parallel>, #tpu.dimension_semantics<parallel>], iteration_bounds = array<i64: 2, 1>, scalar_prefetch = 0 : i64, scratch_operands = 0 : i64, tpu.core_type = #tpu.core_type<tc>, window_params = [{transform_indices = @transform_0, window_bounds = array<i64: 2>}, {transform_indices = @transform_1, window_bounds = array<i64: 1, 4, 256>}, {transform_indices = @transform_2, window_bounds = array<i64: 1, 4, 256>}, {pipeline_mode = #tpu.pipeline_mode<synchronous>, transform_indices = @transform_3, window_bounds = array<i64: 4, 4>}, {pipeline_mode = #tpu.pipeline_mode<synchronous>, transform_indices = @transform_4, window_bounds = array<i64: 4, 1>}, {transform_indices = @transform_5, window_bounds = array<i64: 1, 4, 256>}]} {
    %c0 = arith.constant 0 : index
    %0 = memref.load %arg2[%c0] : memref<2xf32, #tpu.memory_space<smem>>
    %c1 = arith.constant 1 : index
    %1 = memref.load %arg2[%c1] : memref<2xf32, #tpu.memory_space<smem>>
    %c0_0 = arith.constant 0 : index
    %c0_1 = arith.constant 0 : index
    %c0_2 = arith.constant 0 : index
    %2 = vector.load %arg3[%c0_0, %c0_1, %c0_2] : memref<1x4x256xf32, #tpu.memory_space<vmem>>, vector<1x4x256xf32>
    %3 = vector.shape_cast %2 : vector<1x4x256xf32> to vector<4x256xf32>
    %c0_3 = arith.constant 0 : index
    %c0_4 = arith.constant 0 : index
    %c0_5 = arith.constant 0 : index
    %4 = vector.load %arg4[%c0_3, %c0_4, %c0_5] : memref<1x4x256xf32, #tpu.memory_space<vmem>>, vector<1x4x256xf32>
    %5 = vector.shape_cast %4 : vector<1x4x256xf32> to vector<4x256xf32>
    %6 = vector.broadcast %0 : f32 to vector<4x256xf32>
    %7 = arith.mulf %6, %3 : vector<4x256xf32>
    %8 = vector.broadcast %1 : f32 to vector<4x256xf32>
    %9 = arith.mulf %8, %5 : vector<4x256xf32>
    %10 = arith.addf %7, %9 : vector<4x256xf32>
    %11 = arith.negf %10 : vector<4x256xf32>
    %12 = math.exp %11 : vector<4x256xf32>
    %cst = arith.constant 1.000000e+00 : f32
    %13 = vector.broadcast %cst : f32 to vector<4x256xf32>
    %14 = arith.addf %13, %12 : vector<4x256xf32>
    %15 = arith.divf %13, %14 : vector<4x256xf32>
    %16 = arith.mulf %10, %15 : vector<4x256xf32>
    %c0_6 = arith.constant 0 : index
    %c0_7 = arith.constant 0 : index
    %17 = vector.load %arg5[%c0_6, %c0_7] : memref<4x4xf32, #tpu.memory_space<vmem>>, vector<4x4xf32>
    %cst_8 = arith.constant dense<0.000000e+00> : vector<4x256xf32>
    %18 = tpu.matmul %17, %16, %cst_8 {dimension_numbers = #tpu.dot_dimension_numbers<[1], [0], [0], [1], [0, 0, 1, 1], [], []>} : vector<4x4xf32>, vector<4x256xf32>, vector<4x256xf32> -> vector<4x256xf32>
    %c0_9 = arith.constant 0 : index
    %c0_10 = arith.constant 0 : index
    %19 = vector.load %arg6[%c0_9, %c0_10] : memref<4x1xf32, #tpu.memory_space<vmem>>, vector<4x1xf32>
    %20 = vector.broadcast %19 : vector<4x1xf32> to vector<4x256xf32>
    %21 = arith.addf %18, %20 : vector<4x256xf32>
    %c0_11 = arith.constant 0 : index
    %c0_12 = arith.constant 0 : index
    %c0_13 = arith.constant 0 : index
    %22 = vector.load %arg7[%c0_11, %c0_12, %c0_13] : memref<1x4x256xf32, #tpu.memory_space<vmem>>, vector<1x4x256xf32>
    %23 = vector.shape_cast %22 : vector<1x4x256xf32> to vector<4x256xf32>
    %24 = vector.shape_cast %21 : vector<4x256xf32> to vector<1x4x256xf32>
    tpu.vector_store %arg7[%c0_11, %c0_12, %c0_13], %24 {strides = array<i32>} : memref<1x4x256xf32, #tpu.memory_space<vmem>>, vector<1x4x256xf32>,
    return
  }
  func.func @transform_0(%arg0: i32, %arg1: i32) -> i32 {
    %c0_i32 = arith.constant 0 : i32
    %c0_i32_0 = arith.constant 0 : i32
    return %c0_i32 : i32
  }
  func.func @transform_1(%arg0: i32, %arg1: i32) -> (i32, i32, i32) {
    %c0_i32 = arith.constant 0 : i32
    %c0_i32_0 = arith.constant 0 : i32
    return %arg0, %c0_i32, %arg1 : i32, i32, i32
  }
  func.func @transform_2(%arg0: i32, %arg1: i32) -> (i32, i32, i32) {
    %c0_i32 = arith.constant 0 : i32
    %c0_i32_0 = arith.constant 0 : i32
    return %arg0, %c0_i32, %arg1 : i32, i32, i32
  }
  func.func @transform_3(%arg0: i32, %arg1: i32) -> (i32, i32) {
    %c0_i32 = arith.constant 0 : i32
    %c0_i32_0 = arith.constant 0 : i32
    %c0_i32_1 = arith.constant 0 : i32
    return %c0_i32, %c0_i32_0 : i32, i32
  }
  func.func @transform_4(%arg0: i32, %arg1: i32) -> (i32, i32) {
    %c0_i32 = arith.constant 0 : i32
    %c0_i32_0 = arith.constant 0 : i32
    %c0_i32_1 = arith.constant 0 : i32
    return %c0_i32, %c0_i32_0 : i32, i32
  }
  func.func @transform_5(%arg0: i32, %arg1: i32) -> (i32, i32, i32) {
    %c0_i32 = arith.constant 0 : i32
    %c0_i32_0 = arith.constant 0 : i32
    return %arg0, %c0_i32, %arg1 : i32, i32, i32
  }
}

</mosaic_0001>

<bundles_post_ra>
// kernel: tpu_custom_call.1
= control target key start
LH: loop header
LB: loop body
LE: loop exit
PB: predicated region body
PF: predicated region fallthrough
CT: control target
= control target key end

     0   :  { %s1132_s0 = inlined_call_operand.vmem [shape: f32[2], index: 0, kind: input, shape index: {}]   ;;  %s1133_s1 = inlined_call_operand.hbm [shape: f32[2,4,256], index: 1, kind: input, shape index: {}]   ;;  %s1134_s2 = inlined_call_operand.hbm [shape: f32[2,4,256], index: 2, kind: input, shape index: {}]   ;;  %s1135_s3 = inlined_call_operand.vmem [shape: f32[4,4], index: 3, kind: input, shape index: {}]   ;;  %s1136_s4 = inlined_call_operand.vmem [shape: f32[4,1], index: 4, kind: input, shape index: {}]   ;;  %s1137_s5 = inlined_call_operand.hbm [shape: f32[2,4,256], index: 5, kind: output, shape index: {}]  }
   0x1   :  { %1146 = sst [smem:[#allocation16_spill]] %s1132_s0 }
   0x2   :  { %1147 = sst [smem:[#allocation17_spill]] %s1133_s1 }
   0x3   :  { %10 = vsyncpa [#allocation5], 0 }
   0x4   :  { %11 = vsyncpa [#allocation3], 0 }
   0x5   :  { %13 = vsyncpa [#allocation3 + $0x1], 0 }
   0x6   :  { %14 = vsyncpa [#allocation8], 0 }
   0x7   :  { %16 = vsyncpa [#allocation8 + $0x1], 0 }
   0x8   :  { %17 = vsyncpa [#allocation4], 0 }
   0x9   :  { %19 = vsyncpa [#allocation4 + $0x1], 0  ;;  %s884_s18 = smov 0   ;;  %s886_s19 = smov 0  }
   0xa   :  { %s888_s20 = smov 0   ;;  %s890_s21 = smov 0  }
   0xb   :  { %s892_s22 = smov 0   ;;  %s894_s23 = smov 0  }
   0xc LB: > { %1148 = sst [smem:[#allocation14_spill]] %s842_s22  ;;  %s567_s24 = sadd.s32 4294967295, %s846_s23   ;;  %s846_s23 = sphi %s894_s23, %s25_s23   ;;  %s842_s22 = sphi %s892_s22, %s1168_s22   ;;  %s838_s21 = sphi %s890_s21, %s1167_s21   ;;  %s834_s20 = sphi %s888_s20, %s1171_s20   ;;  %s830_s19 = sphi %s886_s19, %s1170_s19   ;;  %s826_s18 = sphi %s884_s18, %s1169_s18  }
   0xd   : > { %s568_s25 = sadd.s32 4294967294, %s846_s23   ;;  %p80_p0 = scmp.ne.s32.totalorder %s830_s19, %s826_s18 }
   0xe   : > { %p918_p1 = scmp.eq.s32.totalorder %s567_s24, 0  ;;  %p922_p2 = scmp.eq.s32.totalorder %s567_s24, 1 }
   0xf   : > { %p182_p3 = scmp.eq.s32.totalorder %s568_s25, 1  ;;  %p569_p5 = scmp.ge.s32.totalorder %s846_s23, 1 }
  0x10   : > { %s1149_s26 = scalar_select %p918_p1, 1, 0 }
  0x11   : > { %p928_p4 = por %p918_p1, %p80_p0  ;;  %p933_p6 = por %p182_p3, %p80_p0 }
  0x12   : > { %p189_p7 = scmp.lt.s32.totalorder %s846_s23, 3  ;;  %s1153_s0 = sld [smem:[#allocation16_spill]] }
  0x13   : > { %s1151_s28 = scalar_select %p928_p4, 1, 0 }
  0x14   : > { %s1152_s29 = scalar_select %p933_p6, 1, 0 }
  0x15   : > { %p941_p8 = pnand %p569_p5, %p189_p7  ;;  %s37_s10 = sadd.s32 1, %s842_s22 }
  0x16   : > { %s67_s11 = sadd.s32 1, %s834_s20  ;;  %p39_p12 = scmp.ge.s32.totalorder %s37_s10, 2 }
  0x17   : > { %s1154_s8 = scalar_select %p941_p8, 1, 0 }
  0x18   : > { %s202_s7 = sshll.u32 %s1153_s0, 4  ;;  %p606_p10 = pneg %p941_p8  ;;  %s203_s7 = int_to_ptr.vmem [resolvable:$true] %s202_s7 }
  0x19   : > { %s681_s12 = scalar_lea.vmem %s203_s7, 16  ;;  %p689_p7 = scmp.lt.s32.totalorder %s203_s7, %s203_s7 }
  0x1a   : > { %p950_p11 = pnand %p606_p10, %p918_p1  ;;  %p682_p13 = scmp.ne.s32.totalorder %s203_s7, %s681_s12 }
  0x1b   : > { %p690_p6 = scmp.lt.s32.totalorder %s681_s12, %s681_s12 }
  0x1c   : > { %p683_p0 = pneg %p950_p11 }
  0x1d   : > { %p691_p9 = por %p690_p6, %p689_p7 }
  0x1e   : > { %p684_p3 = pnand %p683_p0, %p682_p13 }
  0x20   : > { %p685_p5 = pneg %p684_p3 }
  0x22   : > { %p692_p4 = pnand %p691_p9, %p685_p5 }
  0x24   : > { %695 = shalt.err (!%p692_p4)
}
  0x25   : > { %s848_s13 = smov [#allocation2]   ;;  %s1173_s10 = smov (%p39_p12, %s37_s10), 0 }
  0x26   : > { %609 = dma.vmem_to_smem (!%p950_p11), %s203_s7, 16, %s848_s13, [#allocation5]  }
  0x27   : > { %1156 = sst [smem:[#allocation15_spill]] %s1173_s10  ;;  %p74_p10 = scmp.ne.s32.totalorder %s834_s20, %s830_s19 }
  0x28   : > { %p75_p6 = scmp.eq.s32.totalorder %s846_s23, 0  ;;  %s62_s14 = ssub.s32 %s842_s22, %s1173_s10 }
  0x29   : > { %p622_p4 = scmp.lt.s32.totalorder %s846_s23, 2  ;;  %p65_p9 = scmp.eq.s32.totalorder %s62_s14, 0 }
  0x2a   : > { %p76_p13 = por %p75_p6, %p74_p10  ;;  %p970_p0 = por %p922_p2, %p74_p10 }
  0x2b   : > { %s975_s16 = sand.u32 1, %s834_s20   ;;  %s593_s25 = sshll.u32 %s842_s22, 7 }
  0x2c   : > { %s1157_s15 = scalar_select %p970_p0, 1, 0 }
  0x2d   : > { %s978_s17 = scalar_select %p65_p9, %s834_s20, %s67_s11  }
  0x2e   : > { %s1139_s24 = sshll.u32 %s975_s16, 3  ;;  %s1158_s1 = sld [smem:[#allocation17_spill]] }
  0x2f   : > { %s223_s27 = scalar_lea.vmem [#allocation6], %s1139_s24  ;;  %p991_p2 = pnand %p622_p4, %p76_p13 }
  0x30   : > { %s233_s9 = sshll.u32 %s223_s27, 4  ;;  %s998_s14 = scalar_lea.hbm %s1134_s2, %s593_s25  ;;  %s989_s9 = int_to_ptr.vmem [resolvable:$true] %s233_s9 }
  0x31   : > { %s220_s30 = scalar_lea.sflag [#allocation3], %s975_s16  ;;  %p698_p12 = pneg %p991_p2 }
  0x34   : > { %s985_s7 = scalar_lea.hbm %s1158_s1, %s593_s25  ;;  %s701_s0 = scalar_lea.hbm %s1158_s1, 256 }
  0x35   : > { %s696_s6 = scalar_lea.hbm %s985_s7, 128  ;;  %p702_p7 = scmp.lt.u32.totalorder %s985_s7, %s1158_s1 }
  0x36   : > { %p697_p11 = scmp.ne.s32.totalorder %s985_s7, %s696_s6  ;;  %p703_p10 = scmp.lt.u32.totalorder %s701_s0, %s696_s6 }
  0x37   : > { %p705_p4 = scmp.lt.u32.totalorder %s696_s6, %s985_s7 }
  0x38   : > { %p699_p3 = pnand %p698_p12, %p697_p11  ;;  %p704_p6 = por %p703_p10, %p702_p7 }
  0x3a   : > { %p700_p5 = pneg %p699_p3  ;;  %p706_p9 = por %p705_p4, %p704_p6 }
  0x3c   : > { %p707_p13 = pnand %p706_p9, %p700_p5 }
  0x3e   : > { %710 = shalt.err (!%p707_p13)
}
  0x3f   : > { %s711_s25 = scalar_lea.vmem %s989_s9, 128  ;;  %s849_s24 = smov [#allocation6]  }
  0x40   : > { %p712_p11 = scmp.ne.s32.totalorder %s989_s9, %s711_s25  ;;  %s716_s11 = sshll.u32 %s849_s24, 4  ;;  %s717_s11 = int_to_ptr.vmem [resolvable:$false] %s716_s11 }
  0x41   : > { %s718_s22 = scalar_lea.vmem %s717_s11, 256  ;;  %p719_p1 = scmp.lt.s32.totalorder %s989_s9, %s717_s11 }
  0x42   : > { %p714_p3 = pnand %p712_p11, %p698_p12  ;;  %p720_p7 = scmp.lt.s32.totalorder %s718_s22, %s711_s25 }
  0x44   : > { %p715_p0 = pneg %p714_p3  ;;  %p721_p10 = por %p720_p7, %p719_p1 }
  0x46   : > { %p722_p6 = pnand %p721_p10, %p715_p0 }
  0x48   : > { %725 = shalt.err (!%p722_p6)
}
  0x49   : > { %613 = dma.hbm_to_vmem [thread:$0]  (!%p991_p2), %s985_s7, 128, %s989_s9, %s220_s30  }
  0x4a   : > { %s1160_s0 = sshll.u32 %s975_s16, 3  ;;  %s241_s6 = scalar_lea.sflag [#allocation8], %s975_s16 }
  0x4b   : > { %s244_s10 = scalar_lea.vmem [#allocation7], %s1160_s0  ;;  %s726_s27 = scalar_lea.hbm %s998_s14, 128 }
  0x4c   : > { %s254_s13 = sshll.u32 %s244_s10, 4  ;;  %p727_p1 = scmp.ne.s32.totalorder %s998_s14, %s726_s27  ;;  %s255_s13 = int_to_ptr.vmem [resolvable:$true] %s254_s13 }
  0x4d   : > { %s731_s11 = scalar_lea.hbm %s1134_s2, 256  ;;  %p732_p4 = scmp.lt.u32.totalorder %s998_s14, %s1134_s2 }
  0x4e   : > { %p729_p0 = pnand %p727_p1, %p698_p12  ;;  %p733_p9 = scmp.lt.u32.totalorder %s731_s11, %s726_s27 }
  0x4f   : > { %p735_p11 = scmp.lt.u32.totalorder %s726_s27, %s998_s14 }
  0x50   : > { %p730_p5 = pneg %p729_p0  ;;  %p734_p13 = por %p733_p9, %p732_p4 }
  0x52   : > { %p736_p3 = por %p735_p11, %p734_p13 }
  0x54   : > { %p737_p7 = pnand %p736_p3, %p730_p5 }
  0x56   : > { %740 = shalt.err (!%p737_p7)
}
  0x57   : > { %s741_s16 = scalar_lea.vmem %s255_s13, 128  ;;  %s850_s7 = smov [#allocation7]  }
  0x58   : > { %p742_p10 = scmp.ne.s32.totalorder %s255_s13, %s741_s16  ;;  %s746_s9 = sshll.u32 %s850_s7, 4  ;;  %s747_s9 = int_to_ptr.vmem [resolvable:$false] %s746_s9 }
  0x59   : > { %s748_s30 = scalar_lea.vmem %s747_s9, 256  ;;  %p749_p0 = scmp.lt.s32.totalorder %s255_s13, %s747_s9 }
  0x5a   : > { %p744_p6 = pnand %p742_p10, %p698_p12  ;;  %p750_p8 = scmp.lt.s32.totalorder %s748_s30, %s741_s16 }
  0x5c   : > { %p745_p1 = pneg %p744_p6  ;;  %p751_p4 = por %p750_p8, %p749_p0 }
  0x5e   : > { %p752_p9 = pnand %p751_p4, %p745_p1 }
  0x60   : > { %755 = shalt.err (!%p752_p9)
}
  0x61   : > { %616 = dma.hbm_to_vmem [thread:$0]  (!%p991_p2), %s998_s14, 128, %s255_s13, %s241_s6  }
  0x62   : > { %p1161_p5 = scmp.ne.s32.totalorder %s1154_s8, 0 }
  0x63   : > { %p1162_p13 = scmp.ne.s32.totalorder (!%p1161_p5), %s1149_s26, 0 }
  0x64   : > { %263 = sbr.rel (%p1161_p5) target bundleno = 390 (0x186), region = 40 }
  0x6b   : > { %809 = dma.done.wait (%p1162_p13), [#allocation5], 16  }
  0x6c   : > { %811 = vsyncadd (%p1162_p13), [#allocation5], 4294967280  ;;  %s1055_s1 = sand.u32 1, %s830_s19   ;;  %p1163_p8 = scmp.ne.s32.totalorder %s1151_s28, 0 }
  0x6d   : > { %s1058_s0 = sshll.u32 %s1055_s1, 3  ;;  %s270_s12 = scalar_lea.sflag [#allocation3], %s1055_s1 }
  0x6e   : > { %s273_s14 = scalar_lea.vmem [#allocation6], %s1058_s0 }
  0x6f   : > { %813 = dma.done.wait (%p1163_p8), %s270_s12, 128  }
  0x70   : > { %815 = vsyncadd (%p1163_p8), %s270_s12, 4294967168  ;;  %s279_s26 = scalar_lea.sflag [#allocation8], %s1055_s1  ;;  %s282_s8 = scalar_lea.vmem [#allocation7], %s1058_s0 }
  0x71   : > { %817 = dma.done.wait (%p1163_p8), %s279_s26, 128  }
  0x72   : > { %819 = vsyncadd (%p1163_p8), %s279_s26, 4294967168 }
  0x73   : > { %287 = sfence }
  0x74   : > { %s318_s10 = sld [smem:[#allocation2]]  ;;  %s583_s13 = sld [smem:[#allocation2 + $0x1]]  ;;  %v851_v0 = vmov 0.0   ;;  %v852_v1 = vmov 0   ;;  %v335_v2 = vld [vmem:[%s1136_s4] sm:$0xf] }
  0x75   : > { %416 = vmatprep.mubr.f32.mxu0 %v851_v0  ;;  %676 = vset.pattern.permute.xlu0 %v852_v1  ;;  %v320_v3 = vld [vmem:[%s273_s14] sm:$0xff]  ;;  %v321_v4 = vld [vmem:[%s282_s8] sm:$0xff]  ;;  %vm347_vm0 = vcmask 1043456   ;;  %vm343_vm1 = vcmask 31744   ;;  %s595_s24 = sshll.u32 %s838_s21, 7  ;;  %s314_s11 = scalar_lea.vmem [#allocation9], %s1058_s0 }
  0x76   : > { %338 = vperm.xlu0 %676, %v335_v2   ;;  %v334_v16 = vld [vmem:[%s1135_s3] sm:$0xf]  ;;  %s445_s22 = sshll.u32 %s314_s11, 4  ;;  %s1083_s9 = scalar_lea.hbm %s1137_s5, %s595_s24  ;;  %s1085_s22 = int_to_ptr.vmem [resolvable:$true] %s445_s22 }
  0x77   : > { %s429_s30 = scalar_lea.sflag [#allocation4], %s1055_s1  ;;  %s756_s12 = scalar_lea.vmem %s1085_s22, 128 }
  0x78   : > { %p757_p2 = scmp.ne.s32.totalorder %s1085_s22, %s756_s12  ;;  %p1164_p12 = scmp.ne.s32.totalorder %s1157_s15, 0 }
  0x79   : > { %s853_s21 = smov [#allocation9]  }
  0x7a   : > { %v322_v5 = vstv %s318_s10  ;;  %v324_v6 = vstv %s583_s13  ;;  %p758_p11 = pnand %p757_p2, %p1164_p12  ;;  %s760_s0 = sshll.u32 %s853_s21, 4  ;;  %s761_s0 = int_to_ptr.vmem [resolvable:$false] %s760_s0 }
  0x7b   : > { %v323_v7 = vmul.f32 %v322_v5, %v320_v3  ;;  %v325_v8 = vmul.f32 %v324_v6, %v321_v4  ;;  %s762_s14 = scalar_lea.vmem %s761_s0, 256  ;;  %p763_p7 = scmp.lt.s32.totalorder %s1085_s22, %s761_s0 }
  0x7c   : > { %p759_p3 = pneg %p758_p11  ;;  %p764_p10 = scmp.lt.s32.totalorder %s762_s14, %s756_s12 }
  0x7d   : > { %v326_v9 = vadd.f32 %v325_v8, %v323_v7 }
  0x7e   : > { %p765_p6 = por %p764_p10, %p763_p7 }
  0x7f   : > { %v584_v10 = vmul.f32 -1.442695, %v326_v9 }
  0x80   : > { %p766_p1 = pnand %p765_p6, %p759_p3 }
  0x81   : > { %677 = vpow2.f32 %v584_v10 }
  0x8b   : > { %v678_v11 = vpop.eup %677 }
  0x8c   : > { %v330_v12 = vadd.f32 1.0, %v678_v11 }
  0x8e   : > { %679 = vrcp.f32 %v330_v12 }
  0x98   : > { %v680_v13 = vpop.eup %679 }
  0x99   : > { %v333_v14 = vmul.f32 %v680_v13, %v326_v9 }
  0x9b   : > { %v342_v15 = vcombine.high %v333_v14, %v333_v14 }
  0x9d   : > { %585 = vmatprep.subr.msk.mxu0 %vm347_vm0, %v342_v15 }
  0x9e   : > { %586 = vmatpush1.msk.msra.mxu0 %vm347_vm0, %v333_v14 }
  0x9f   : > { %587 = vmatmul.mubr.msk.f32.vlgmr.msra.gmra.mrb[0].mxu0 %vm343_vm1, %v334_v16 }
  0xf5   : > { %v339_v17 = vpop.permute.xlu0 %338 }
 0x172   : > { %v418_v18 = vpop.f32.mrb[0].mxu0 }
 0x173   : > { %v419_v19 = vadd.f32 %v418_v18, %v339_v17  ;;  %v420_v20 = vpop.f32.mrb[1].mxu0 }
 0x174   : > { %v421_v21 = vadd.f32 %v420_v20, %v339_v17 }
 0x176   : > { %v425_v22 = vcombine.low %v419_v19, %v421_v21 }
 0x178   : > { %427 = vst [vmem:[%s314_s11] sm:$0xff] %v425_v22 }
 0x179   : > { %769 = shalt.err (!%p766_p1)
}
 0x17a   : > { %s770_s1 = scalar_lea.hbm %s1083_s9, 128  ;;  %s774_s10 = scalar_lea.hbm %s1137_s5, 256 }
 0x17b   : > { %p771_p0 = scmp.ne.s32.totalorder %s1083_s9, %s770_s1  ;;  %p775_p5 = scmp.lt.u32.totalorder %s1083_s9, %s1137_s5 }
 0x17c   : > { %p776_p13 = scmp.lt.u32.totalorder %s774_s10, %s770_s1  ;;  %p778_p2 = scmp.lt.u32.totalorder %s770_s1, %s1083_s9 }
 0x17d   : > { %p772_p4 = pnand %p771_p0, %p1164_p12 }
 0x17e   : > { %p777_p8 = por %p776_p13, %p775_p5 }
 0x17f   : > { %p773_p9 = pneg %p772_p4 }
 0x180   : > { %p779_p11 = por %p778_p2, %p777_p8 }
 0x182   : > { %p780_p3 = pnand %p779_p11, %p773_p9 }
 0x184   : > { %783 = shalt.err (!%p780_p3)
}
 0x185   : > { %604 = dma.vmem_to_hbm [thread:$0]  (%p1164_p12), %s1085_s22, 128, %s1083_s9, %s429_s30  }
 0x186 PF: > { %s457_s27 = sand.u32 1, %s826_s18   ;;  %p1165_p7 = scmp.ne.s32.totalorder %s1152_s29, 0 }
 0x187   : > { %p1166_p10 = scmp.ge.s32.totalorder %s846_s23, 2  ;;  %s458_s28 = scalar_lea.sflag [#allocation4], %s457_s27 }
 0x189   : > { %p618_p6 = pnand %p1166_p10, %p1165_p7 }
 0x18b   : > { %821 = dma.done.wait (!%p618_p6), %s458_s28, 128  }
 0x18c   : > { %823 = vsyncadd (!%p618_p6), %s458_s28, 4294967168  ;;  %s25_s23 = sadd.s32 1, %s846_s23   ;;  %s1167_s21 = sld [smem:[#allocation14_spill]] }
 0x18d   : > { %p22_p1 = scmp.ge.s32.totalorder %s25_s23, 4   ;;  %s1168_s22 = sld [smem:[#allocation15_spill]] }
 0x18e   : > { %s1169_s18 = smov %s830_s19  ;;  %s1170_s19 = smov %s834_s20 }
 0x18f   : > { %s1171_s20 = smov %s978_s17  ;;  %24 = sbr.rel (!%p22_p1) target bundleno = 12 (0xc), region = 103 }
 0x196   :  { %463 = vsyncpa [#allocation3], 1 }
 0x197   :  { %465 = vsyncpa [#allocation3 + $0x1], 1 }
 0x198   :  { %466 = vsyncpa [#allocation8], 1 }
 0x199   :  { %468 = vsyncpa [#allocation8 + $0x1], 1 }
 0x19a   :  { %469 = vsyncpa [#allocation4], 1 }
 0x19b   :  { %471 = vsyncpa [#allocation4 + $0x1], 1 }
 0x19c   :  { %472 = vsyncpa [#allocation5], 1 }
 0x19d   :  { %474 = vsyncpa [#allocation5 + $0x1], 1 }

</bundles_post_ra>
